<compile_context>
chip_gen: v7x
topology: tpu7x:2x2x1
jax: 0.10.0
libtpu: 0.0.40
codegen_flags: <defaults>
</compile_context>

<pallas_src>
from functools import partial

import numpy as np
import jax
import jax.numpy as jnp
from jax.experimental import pallas as pl
from jax.experimental.pallas import tpu as pltpu


# ---------------------------------------------------------------------------
# Weight-slab layout (static, 8-aligned row regions; all blocks pre-transposed)
# ---------------------------------------------------------------------------
SLAB_COLS = 16
R_W1T = 0      # [8,16] conv1 unrolled^T (cols 0-6: j, cols 8-14: jd, gaps zero)
R_W2T = 8      # [8, 8] conv2 unrolled^T
R_WF1OT = 16   # [8, 8] fc_emb^T, obs columns
R_WF1FT = 24   # [8, 8] fc_emb^T, fm_c2 columns
R_WF2T = 32    # [8, 8] fc_emb_2^T
R_WD1T = 40    # [8, 8] deconv1 unrolled^T
R_WD2A3T = 48  # [8, 8] (deconv2 fm-rows @ deconv3)^T     (deconv3 folded in)
R_WD2B3T = 56  # [8, 8] (deconv2 fm_c1-rows @ deconv3)^T  (deconv3 folded in)
R_WD3BT = 64   # [8, 8] deconv3 j-rows^T
R_BIAS = 72    # [8, 8] bias columns: 0=b1 1=b2 2=bf1 3=bf2 4=bd1 5=b_out(folded)
SLAB_ROWS = 80


def policy_kernel(xT_ref, w_ref, out_ref):
    # 8-aligned activation views ([features, TB], batch on lanes).
    obs = xT_ref[0:8, :]      # obs(4) | zero(4)
    jjd = xT_ref[8:24, :]     # j(7) | 0 | jd(7) | 0
    j = xT_ref[8:16, :]       # j(7) | 0

    def w8(r):                # [8, 8] weight block (out-rows x in-cols, zero padded)
        return w_ref[r:r + 8, 0:8]

    def b(c):                 # [8, 1] bias column, broadcast over lanes
        return w_ref[R_BIAS:R_BIAS + 8, c:c + 1]

    dot = lambda a, m: jnp.dot(a, m, preferred_element_type=jnp.float32)

    # conv1 (Conv1d 2->2, k=3, s=2) on cat(j, jd): single [8,16] matmul -> [8, TB]
    fm_c1 = jnp.tanh(dot(w_ref[R_W1T:R_W1T + 8, 0:16], jjd) + b(0))
    # conv2 (Conv1d 2->4, k=3, s=1)
    fm_c2 = jnp.tanh(dot(w8(R_W2T), fm_c1) + b(1))
    # fc_emb on cat(obs, fm_c2), then fc_emb_2
    e = jnp.tanh(dot(w8(R_WF1OT), obs) + dot(w8(R_WF1FT), fm_c2) + b(2))
    e = jnp.tanh(dot(w8(R_WF2T), e) + b(3))
    # deconv1 (ConvTranspose1d 4->2, k=3, s=1)
    fm = jnp.tanh(dot(w8(R_WD1T), e) + b(4))
    # deconv2 + deconv3 folded (both linear, no activation between) -> rows 0-6 of out
    out_ref[...] = (dot(w8(R_WD2A3T), fm)
                    + dot(w8(R_WD2B3T), fm_c1)
                    + dot(w8(R_WD3BT), j)
                    + b(5))


# ---------------------------------------------------------------------------
# Parameter construction (synthetic, torch layouts) and unrolling into the slab
# ---------------------------------------------------------------------------
def init_params(key):
    ks = jax.random.split(key, 14)

    def u(k, shape, fan_in):
        bound = 1.0 / np.sqrt(fan_in)
        return np.asarray(jax.random.uniform(k, shape, jnp.float32, -bound, bound))

    p = {}
    p["fc_emb_w"] = u(ks[0], (4, 8), 8);       p["fc_emb_b"] = u(ks[1], (4,), 8)
    p["fc_emb2_w"] = u(ks[2], (4, 4), 4);      p["fc_emb2_b"] = u(ks[3], (4,), 4)
    p["conv1_w"] = u(ks[4], (2, 2, 3), 6);     p["conv1_b"] = u(ks[5], (2,), 6)
    p["conv2_w"] = u(ks[6], (4, 2, 3), 6);     p["conv2_b"] = u(ks[7], (4,), 6)
    p["deconv1_w"] = u(ks[8], (4, 2, 3), 12);  p["deconv1_b"] = u(ks[9], (2,), 12)
    p["deconv2_w"] = u(ks[10], (4, 2, 3), 12); p["deconv2_b"] = u(ks[11], (2,), 12)
    p["deconv3_w"] = u(ks[12], (3, 1, 1), 3);  p["deconv3_b"] = u(ks[13], (1,), 3)
    return p


def build_slab(p):
    """Unroll convs/deconvs into dense matrices (f64), fold deconv3 into deconv2,
    transpose everything to [out, in] and pack (zero-padded) into one [80, 16] slab."""
    f64 = np.float64

    # conv1: in [2,7] -> out [2,3], k=3, s=2  (channel-major flattening: flat = c*L + t)
    W1 = np.zeros((14, 6), f64)
    for o in range(2):
        for i in range(2):
            for t in range(3):
                for k in range(3):
                    W1[i * 7 + 2 * t + k, o * 3 + t] += p["conv1_w"][o, i, k]
    b1 = np.zeros((6,), f64)
    for o in range(2):
        for t in range(3):
            b1[o * 3 + t] = p["conv1_b"][o]

    # conv2: in [2,3] -> out [4,1], k=3, s=1
    W2 = np.zeros((6, 4), f64)
    for o in range(4):
        for i in range(2):
            for k in range(3):
                W2[i * 3 + k, o] += p["conv2_w"][o, i, k]
    b2 = p["conv2_b"].astype(f64)

    # fc layers (torch Linear: y = x @ W.T + b); input = cat(obs[4], fm_c2[4])
    wf1 = p["fc_emb_w"].T.astype(f64)            # [8, 4]
    wf1o, wf1f = wf1[:4], wf1[4:]
    bf1 = p["fc_emb_b"].astype(f64)
    wf2 = p["fc_emb2_w"].T.astype(f64)           # [4, 4]
    bf2 = p["fc_emb2_b"].astype(f64)

    # deconv1: in [4,1] -> out [2,3], k=3, s=1
    Wd1 = np.zeros((4, 6), f64)
    for i in range(4):
        for o in range(2):
            for k in range(3):
                Wd1[i, o * 3 + k] += p["deconv1_w"][i, o, k]
    bd1 = np.zeros((6,), f64)
    for o in range(2):
        for t in range(3):
            bd1[o * 3 + t] = p["deconv1_b"][o]

    # deconv2: in [4,3] -> out [2,7], k=3, s=2
    Wd2 = np.zeros((12, 14), f64)
    for i in range(4):
        for o in range(2):
            for t in range(3):
                for k in range(3):
                    Wd2[i * 3 + t, o * 7 + 2 * t + k] += p["deconv2_w"][i, o, k]
    bd2 = np.zeros((14,), f64)
    for o in range(2):
        for pos in range(7):
            bd2[o * 7 + pos] = p["deconv2_b"][o]

    # deconv3: in [3,7] -> out [1,7], k=1, s=1
    Wd3 = np.zeros((21, 7), f64)
    for i in range(3):
        for pos in range(7):
            Wd3[i * 7 + pos, pos] += p["deconv3_w"][i, 0, 0]
    bd3 = np.full((7,), p["deconv3_b"][0], f64)

    # Fold deconv3 into deconv2 (linear ∘ linear, no activation in between -> exact).
    wd2a, wd2b = Wd2[:6], Wd2[6:]          # rows for fm (deconv1 out) / fm_c1
    wd3a, wd3b = Wd3[:14], Wd3[14:]        # rows for deconv2-out / j
    WD2A3 = wd2a @ wd3a                    # [6, 7]
    WD2B3 = wd2b @ wd3a                    # [6, 7]
    BOUT = bd2 @ wd3a + bd3                # [7]

    slab = np.zeros((SLAB_ROWS, SLAB_COLS), np.float32)

    def put(r, c, m):
        m = np.asarray(m, f64)
        slab[r:r + m.shape[0], c:c + m.shape[1]] = m.astype(np.float32)

    put(R_W1T, 0, W1[0:7].T)        # cols 0-6  <- j rows of W1
    put(R_W1T, 8, W1[7:14].T)       # cols 8-14 <- jd rows of W1 (gap cols stay zero)
    put(R_W2T, 0, W2.T)
    put(R_WF1OT, 0, wf1o.T)
    put(R_WF1FT, 0, wf1f.T)
    put(R_WF2T, 0, wf2.T)
    put(R_WD1T, 0, Wd1.T)
    put(R_WD2A3T, 0, WD2A3.T)
    put(R_WD2B3T, 0, WD2B3.T)
    put(R_WD3BT, 0, wd3b.T)
    for c, v in enumerate((b1, b2, bf1, bf2, bd1, BOUT)):
        slab[R_BIAS:R_BIAS + v.shape[0], c] = np.asarray(v, np.float32)
    return slab


# ---------------------------------------------------------------------------
# Wrapper: batch-on-lanes grid, resident weight slab, parallel megacore semantics
# ---------------------------------------------------------------------------
def _round_up(n, m):
    return ((n + m - 1) // m) * m


@partial(jax.jit, static_argnames=("tb",))
def conv_policy_forward(x, slab, tb=4096):
    """x: [B, 18] -> [B, 1, 1, 7] (same semantics as ConvPolicy.forward)."""
    B = x.shape[0]
    x = x.astype(jnp.float32)

    # Lane tile: multiple of 128, capped at `tb`, chosen so large batches get >= 2 grid
    # steps (so "parallel" semantics can shard the batch across v7x's 2 TensorCores).
    TB = min(tb, max(128, 128 * ((B // 2) // 128)))
    Bp = _round_up(B, TB)

    # Repack to the 8-aligned transposed layout [24, Bp]:
    #   rows 0-3 obs | 4-7 zero | 8-14 j | 15 zero | 16-22 jd | 23 zero
    zb1 = jnp.zeros((B, 1), jnp.float32)
    zb4 = jnp.zeros((B, 4), jnp.float32)
    x24 = jnp.concatenate([x[:, 0:4], zb4, x[:, 4:11], zb1, x[:, 11:18], zb1], axis=1)
    xT = x24.T                                    # [24, B]
    if Bp != B:
        xT = jnp.pad(xT, ((0, 0), (0, Bp - B)))   # fused with the repack above

    outT = pl.pallas_call(
        policy_kernel,
        out_shape=jax.ShapeDtypeStruct((8, Bp), jnp.float32),
        grid=(Bp // TB,),
        in_specs=[
            pl.BlockSpec((24, TB), lambda i: (0, i)),                 # x^T: pipelined
            pl.BlockSpec((SLAB_ROWS, SLAB_COLS), lambda i: (0, 0)),   # weights: resident
        ],
        out_specs=pl.BlockSpec((8, TB), lambda i: (0, i)),            # lane-dense stores
        compiler_params=pltpu.CompilerParams(
            dimension_semantics=("parallel",)),
    )(xT, slab)

    return outT[:7, :B].T.reshape(B, 1, 1, 7)


# ---------------------------------------------------------------------------
# Numpy reference implementing the exact torch semantics (NCW conv1d)
# ---------------------------------------------------------------------------
def ref_forward(x, p):
    x = np.asarray(x, np.float64)
    obs, j, jd = x[:, :4], x[:, 4:11], x[:, 11:]
    jcat = np.stack([j, jd], 1)  # [B, 2, 7]

    def conv1d(inp, W, b, s):
        B, Ci, L = inp.shape
        Co, _, K = W.shape
        Lo = (L - K) // s + 1
        out = np.zeros((B, Co, Lo))
        for t in range(Lo):
            out[:, :, t] = np.einsum('bik,oik->bo', inp[:, :, t * s:t * s + K], W) + b
        return out

    def deconv1d(inp, W, b, s):
        B, Ci, L = inp.shape
        _, Co, K = W.shape
        Lo = (L - 1) * s + K
        out = np.zeros((B, Co, Lo))
        for t in range(L):
            out[:, :, t * s:t * s + K] += np.einsum('bi,iok->bok', inp[:, :, t], W)
        return out + b[None, :, None]

    fm_c1 = np.tanh(conv1d(jcat, p["conv1_w"], p["conv1_b"], 2))
    fm_c2 = np.tanh(conv1d(fm_c1, p["conv2_w"], p["conv2_b"], 1))
    fm = fm_c2[:, :, 0]
    e = np.tanh(np.concatenate([obs, fm], 1) @ p["fc_emb_w"].T + p["fc_emb_b"])
    e = np.tanh(e @ p["fc_emb2_w"].T + p["fc_emb2_b"])
    e = e[:, :, None]
    fmd = np.tanh(deconv1d(e, p["deconv1_w"], p["deconv1_b"], 1))
    fmd = deconv1d(np.concatenate([fmd, fm_c1], 1), p["deconv2_w"], p["deconv2_b"], 2)
    fmd = deconv1d(np.concatenate([fmd, j[:, None, :]], 1), p["deconv3_w"], p["deconv3_b"], 1)
    return fmd[:, None, :, :]  # [B, 1, 1, 7]


if __name__ == "__main__":
    key = jax.random.PRNGKey(0)
    pkey, xkey, xkey2, xkey3 = jax.random.split(key, 4)

    params = init_params(pkey)
    slab = jnp.asarray(build_slab(params))

    # Small batch, single grid step (TB = 128).
    B = 8
    x = jax.random.normal(xkey, (B, 18), dtype=jnp.float32)
    out = jax.block_until_ready(conv_policy_forward(x, slab))
    ref = ref_forward(np.asarray(x), params)
    np.testing.assert_allclose(np.asarray(out), ref, rtol=1e-4, atol=1e-5)
    assert out.shape == (B, 1, 1, 7)

    # Batch exercising lane padding + a 2-step grid (TB = 128, Bp = 256).
    B2 = 200
    x2 = jax.random.normal(xkey2, (B2, 18), dtype=jnp.float32)
    out2 = jax.block_until_ready(conv_policy_forward(x2, slab))
    ref2 = ref_forward(np.asarray(x2), params)
    np.testing.assert_allclose(np.asarray(out2), ref2, rtol=1e-4, atol=1e-5)
    assert out2.shape == (B2, 1, 1, 7)

    # Larger batch exercising a wider lane tile (TB = 512, 2 grid steps).
    B3 = 1024
    x3 = jax.random.normal(xkey3, (B3, 18), dtype=jnp.float32)
    out3 = jax.block_until_ready(conv_policy_forward(x3, slab))
    ref3 = ref_forward(np.asarray(x3), params)
    np.testing.assert_allclose(np.asarray(out3), ref3, rtol=1e-4, atol=1e-5)
    assert out3.shape == (B3, 1, 1, 7)

    print("KERNEL_OK")
</pallas_src>

<mosaic_0001>
module attributes {stable_mosaic.version = 11 : i64} {
  func.func @policy_kernel(%arg0: i32, %arg1: memref<24x128xf32, #tpu.memory_space<vmem>>, %arg2: memref<80x16xf32, #tpu.memory_space<vmem>>, %arg3: memref<8x128xf32, #tpu.memory_space<vmem>>) attributes {dimension_semantics = [#tpu.dimension_semantics<parallel>], iteration_bounds = array<i64: 1>, scalar_prefetch = 0 : i64, scratch_operands = 0 : i64, tpu.core_type = #tpu.core_type<tc>, window_params = [{transform_indices = @transform_0, window_bounds = array<i64: 24, 128>}, {pipeline_mode = #tpu.pipeline_mode<synchronous>, transform_indices = @transform_1, window_bounds = array<i64: 80, 16>}, {transform_indices = @transform_2, window_bounds = array<i64: 8, 128>}]} {
    %c0 = arith.constant 0 : index
    %c0_0 = arith.constant 0 : index
    %0 = vector.load %arg1[%c0, %c0_0] : memref<24x128xf32, #tpu.memory_space<vmem>>, vector<8x128xf32>
    %c8 = arith.constant 8 : index
    %c0_1 = arith.constant 0 : index
    %1 = vector.load %arg1[%c8, %c0_1] : memref<24x128xf32, #tpu.memory_space<vmem>>, vector<16x128xf32>
    %c8_2 = arith.constant 8 : index
    %c0_3 = arith.constant 0 : index
    %2 = vector.load %arg1[%c8_2, %c0_3] : memref<24x128xf32, #tpu.memory_space<vmem>>, vector<8x128xf32>
    %c0_4 = arith.constant 0 : index
    %c0_5 = arith.constant 0 : index
    %3 = vector.load %arg2[%c0_4, %c0_5] : memref<80x16xf32, #tpu.memory_space<vmem>>, vector<8x16xf32>
    %cst = arith.constant dense<0.000000e+00> : vector<8x128xf32>
    %4 = tpu.matmul %3, %1, %cst {dimension_numbers = #tpu.dot_dimension_numbers<[1], [0], [0], [1], [0, 0, 1, 1], [], []>} : vector<8x16xf32>, vector<16x128xf32>, vector<8x128xf32> -> vector<8x128xf32>
    %c72 = arith.constant 72 : index
    %c0_6 = arith.constant 0 : index
    %5 = vector.load %arg2[%c72, %c0_6] : memref<80x16xf32, #tpu.memory_space<vmem>>, vector<8x1xf32>
    %6 = vector.broadcast %5 : vector<8x1xf32> to vector<8x128xf32>
    %7 = arith.addf %4, %6 : vector<8x128xf32>
    %8 = math.tanh %7 : vector<8x128xf32>
    %c8_7 = arith.constant 8 : index
    %c0_8 = arith.constant 0 : index
    %9 = vector.load %arg2[%c8_7, %c0_8] : memref<80x16xf32, #tpu.memory_space<vmem>>, vector<8x8xf32>
    %cst_9 = arith.constant dense<0.000000e+00> : vector<8x128xf32>
    %10 = tpu.matmul %9, %8, %cst_9 {dimension_numbers = #tpu.dot_dimension_numbers<[1], [0], [0], [1], [0, 0, 1, 1], [], []>} : vector<8x8xf32>, vector<8x128xf32>, vector<8x128xf32> -> vector<8x128xf32>
    %c72_10 = arith.constant 72 : index
    %c1 = arith.constant 1 : index
    %11 = vector.load %arg2[%c72_10, %c1] : memref<80x16xf32, #tpu.memory_space<vmem>>, vector<8x1xf32>
    %12 = vector.broadcast %11 : vector<8x1xf32> to vector<8x128xf32>
    %13 = arith.addf %10, %12 : vector<8x128xf32>
    %14 = math.tanh %13 : vector<8x128xf32>
    %c16 = arith.constant 16 : index
    %c0_11 = arith.constant 0 : index
    %15 = vector.load %arg2[%c16, %c0_11] : memref<80x16xf32, #tpu.memory_space<vmem>>, vector<8x8xf32>
    %cst_12 = arith.constant dense<0.000000e+00> : vector<8x128xf32>
    %16 = tpu.matmul %15, %0, %cst_12 {dimension_numbers = #tpu.dot_dimension_numbers<[1], [0], [0], [1], [0, 0, 1, 1], [], []>} : vector<8x8xf32>, vector<8x128xf32>, vector<8x128xf32> -> vector<8x128xf32>
    %c24 = arith.constant 24 : index
    %c0_13 = arith.constant 0 : index
    %17 = vector.load %arg2[%c24, %c0_13] : memref<80x16xf32, #tpu.memory_space<vmem>>, vector<8x8xf32>
    %cst_14 = arith.constant dense<0.000000e+00> : vector<8x128xf32>
    %18 = tpu.matmul %17, %14, %cst_14 {dimension_numbers = #tpu.dot_dimension_numbers<[1], [0], [0], [1], [0, 0, 1, 1], [], []>} : vector<8x8xf32>, vector<8x128xf32>, vector<8x128xf32> -> vector<8x128xf32>
    %19 = arith.addf %16, %18 : vector<8x128xf32>
    %c72_15 = arith.constant 72 : index
    %c2 = arith.constant 2 : index
    %20 = vector.load %arg2[%c72_15, %c2] : memref<80x16xf32, #tpu.memory_space<vmem>>, vector<8x1xf32>
    %21 = vector.broadcast %20 : vector<8x1xf32> to vector<8x128xf32>
    %22 = arith.addf %19, %21 : vector<8x128xf32>
    %23 = math.tanh %22 : vector<8x128xf32>
    %c32 = arith.constant 32 : index
    %c0_16 = arith.constant 0 : index
    %24 = vector.load %arg2[%c32, %c0_16] : memref<80x16xf32, #tpu.memory_space<vmem>>, vector<8x8xf32>
    %cst_17 = arith.constant dense<0.000000e+00> : vector<8x128xf32>
    %25 = tpu.matmul %24, %23, %cst_17 {dimension_numbers = #tpu.dot_dimension_numbers<[1], [0], [0], [1], [0, 0, 1, 1], [], []>} : vector<8x8xf32>, vector<8x128xf32>, vector<8x128xf32> -> vector<8x128xf32>
    %c72_18 = arith.constant 72 : index
    %c3 = arith.constant 3 : index
    %26 = vector.load %arg2[%c72_18, %c3] : memref<80x16xf32, #tpu.memory_space<vmem>>, vector<8x1xf32>
    %27 = vector.broadcast %26 : vector<8x1xf32> to vector<8x128xf32>
    %28 = arith.addf %25, %27 : vector<8x128xf32>
    %29 = math.tanh %28 : vector<8x128xf32>
    %c40 = arith.constant 40 : index
    %c0_19 = arith.constant 0 : index
    %30 = vector.load %arg2[%c40, %c0_19] : memref<80x16xf32, #tpu.memory_space<vmem>>, vector<8x8xf32>
    %cst_20 = arith.constant dense<0.000000e+00> : vector<8x128xf32>
    %31 = tpu.matmul %30, %29, %cst_20 {dimension_numbers = #tpu.dot_dimension_numbers<[1], [0], [0], [1], [0, 0, 1, 1], [], []>} : vector<8x8xf32>, vector<8x128xf32>, vector<8x128xf32> -> vector<8x128xf32>
    %c72_21 = arith.constant 72 : index
    %c4 = arith.constant 4 : index
    %32 = vector.load %arg2[%c72_21, %c4] : memref<80x16xf32, #tpu.memory_space<vmem>>, vector<8x1xf32>
    %33 = vector.broadcast %32 : vector<8x1xf32> to vector<8x128xf32>
    %34 = arith.addf %31, %33 : vector<8x128xf32>
    %35 = math.tanh %34 : vector<8x128xf32>
    %c48 = arith.constant 48 : index
    %c0_22 = arith.constant 0 : index
    %36 = vector.load %arg2[%c48, %c0_22] : memref<80x16xf32, #tpu.memory_space<vmem>>, vector<8x8xf32>
    %cst_23 = arith.constant dense<0.000000e+00> : vector<8x128xf32>
    %37 = tpu.matmul %36, %35, %cst_23 {dimension_numbers = #tpu.dot_dimension_numbers<[1], [0], [0], [1], [0, 0, 1, 1], [], []>} : vector<8x8xf32>, vector<8x128xf32>, vector<8x128xf32> -> vector<8x128xf32>
    %c56 = arith.constant 56 : index
    %c0_24 = arith.constant 0 : index
    %38 = vector.load %arg2[%c56, %c0_24] : memref<80x16xf32, #tpu.memory_space<vmem>>, vector<8x8xf32>
    %cst_25 = arith.constant dense<0.000000e+00> : vector<8x128xf32>
    %39 = tpu.matmul %38, %8, %cst_25 {dimension_numbers = #tpu.dot_dimension_numbers<[1], [0], [0], [1], [0, 0, 1, 1], [], []>} : vector<8x8xf32>, vector<8x128xf32>, vector<8x128xf32> -> vector<8x128xf32>
    %40 = arith.addf %37, %39 : vector<8x128xf32>
    %c64 = arith.constant 64 : index
    %c0_26 = arith.constant 0 : index
    %41 = vector.load %arg2[%c64, %c0_26] : memref<80x16xf32, #tpu.memory_space<vmem>>, vector<8x8xf32>
    %cst_27 = arith.constant dense<0.000000e+00> : vector<8x128xf32>
    %42 = tpu.matmul %41, %2, %cst_27 {dimension_numbers = #tpu.dot_dimension_numbers<[1], [0], [0], [1], [0, 0, 1, 1], [], []>} : vector<8x8xf32>, vector<8x128xf32>, vector<8x128xf32> -> vector<8x128xf32>
    %43 = arith.addf %40, %42 : vector<8x128xf32>
    %c72_28 = arith.constant 72 : index
    %c5 = arith.constant 5 : index
    %44 = vector.load %arg2[%c72_28, %c5] : memref<80x16xf32, #tpu.memory_space<vmem>>, vector<8x1xf32>
    %45 = vector.broadcast %44 : vector<8x1xf32> to vector<8x128xf32>
    %46 = arith.addf %43, %45 : vector<8x128xf32>
    %c0_29 = arith.constant 0 : index
    %c0_30 = arith.constant 0 : index
    %47 = vector.load %arg3[%c0_29, %c0_30] : memref<8x128xf32, #tpu.memory_space<vmem>>, vector<8x128xf32>
    tpu.vector_store %arg3[%c0_29, %c0_30], %46 {strides = array<i32>} : memref<8x128xf32, #tpu.memory_space<vmem>>, vector<8x128xf32>,
    return
  }
  func.func @transform_0(%arg0: i32) -> (i32, i32) {
    %c0_i32 = arith.constant 0 : i32
    %c0_i32_0 = arith.constant 0 : i32
    return %c0_i32, %arg0 : i32, i32
  }
  func.func @transform_1(%arg0: i32) -> (i32, i32) {
    %c0_i32 = arith.constant 0 : i32
    %c0_i32_0 = arith.constant 0 : i32
    %c0_i32_1 = arith.constant 0 : i32
    return %c0_i32, %c0_i32_0 : i32, i32
  }
  func.func @transform_2(%arg0: i32) -> (i32, i32) {
    %c0_i32 = arith.constant 0 : i32
    %c0_i32_0 = arith.constant 0 : i32
    return %c0_i32, %arg0 : i32, i32
  }
}

</mosaic_0001>

<bundles_post_ra>
// kernel: conv_policy_forward.1
= control target key start
LH: loop header
LB: loop body
LE: loop exit
PB: predicated region body
PF: predicated region fallthrough
CT: control target
= control target key end

     0   :  { %v825_v0 = vmov 0.0|0.0   ;;  %vm826_vm0 = vmmov 0   ;;  %v827_v3 = vmov 0.0   ;;  %v828_v5 = vmov 0   ;;  %s937_s0 = inlined_call_operand.vmem [shape: f32[24,128], index: 0, kind: input, shape index: {}]   ;;  %s938_s1 = inlined_call_operand.vmem [shape: f32[80,16], index: 1, kind: input, shape index: {}]   ;;  %s939_s2 = inlined_call_operand.vmem [shape: f32[8,128], index: 2, kind: output, shape index: {}]  }
   0x1   :  { %797 = vmatprep.subr.bf16.mxu0 %v825_v0  ;;  %v852_v1 = vld [vmem:[%s937_s0 + $0x8] sm:$0xff]  ;;  %v13_v2 = vld [vmem:[%s937_s0 + $0x10] sm:$0xff]  ;;  %754 = vmatprep.mubr.msk.f32.mxu0 %vm826_vm0, %v827_v3  ;;  %v15_v7 = vld [vmem:[%s938_s1] sm:$0xff]  ;;  %vm22_vm1 = vcmask 130048   ;;  %v829_v8 = vmov 1   ;;  %vm102_vm2 = vcmask 64512  }
   0x2   :  { %v798_v4 = vpack.c.bf16 %v13_v2, %v852_v1  ;;  %809 = vset.pattern.permute.xlu0 %v828_v5  ;;  %v863_v6 = vld [vmem:[%s938_s1 + $0x48] sm:$0xff]  ;;  %757 = vmatprep.subr.mxu1 %v827_v3  ;;  %v11_v15 = vld [vmem:[%s937_s0] sm:$0xff]  ;;  %v177_v16 = vld [vmem:[%s938_s1 + $0x10] sm:$0xff]  ;;  %v830_v17 = vmov 2   ;;  %v831_v26 = vmov 3   ;;  %v832_v34 = vmov 4  }
   0x3   :  { %19 = vperm.xlu0 %809, %v863_v6   ;;  %759 = vmatprep.mubr.msk.f32.mxu1 %vm826_vm0, %v827_v3  ;;  %v97_v13 = vld [vmem:[%s938_s1 + $0x8] sm:$0xff]  ;;  %v178_v22 = vld [vmem:[%s938_s1 + $0x18] sm:$0xff]  ;;  %v331_v32 = vld [vmem:[%s938_s1 + $0x20] sm:$0xff]  ;;  %v833_v43 = vmov 5  }
   0x4   :  { %799 = vmatpush3.bf16.msra.mxu0 %v798_v4  ;;  %811 = vset.pattern.permute.xlu1 %v830_v17  ;;  %v410_v39 = vld [vmem:[%s938_s1 + $0x28] sm:$0xff]  ;;  %v490_v41 = vld [vmem:[%s938_s1 + $0x38] sm:$0xff]  ;;  %v637_v42 = vld [vmem:[%s938_s1 + $0x40] sm:$0xff] }
   0x5   :  { %767 = vmatprep.subr.mxu0 %v827_v3  ;;  %326 = vperm.xlu1 %811, %v863_v6   ;;  %v489_v48 = vld [vmem:[%s938_s1 + $0x30] sm:$0xff] }
   0x7   :  { %755 = vmatmul.mubr.msk.f32.vlgmr.msra.gmra.mrb[0].mxu0 %vm22_vm1, %v15_v7  ;;  %810 = vset.pattern.permute.xlu0 %v829_v8 }
   0x8   :  { %769 = vmatprep.mubr.msk.f32.mxu0 %vm826_vm0, %v827_v3  ;;  %99 = vperm.xlu0 %810, %v863_v6  }
   0x9   :  { %768 = vmatpush3.msra.mxu0 %v11_v15  ;;  %812 = vset.pattern.permute.xlu1 %v831_v26 }
   0xa   :  { %777 = vmatprep.subr.mxu0 %v827_v3  ;;  %333 = vperm.xlu1 %812, %v863_v6  }
   0xb   :  { %770 = vmatmul.mubr.msk.f32.vlgmr.msra.gmra.mrb[2].mxu0 %vm102_vm2, %v177_v16 }
   0xc   :  { %779 = vmatprep.mubr.msk.f32.mxu0 %vm826_vm0, %v827_v3  ;;  %814 = vset.pattern.permute.xlu0 %v833_v43 }
   0xd   :  { %713 = vperm.xlu0 %814, %v863_v6  }
   0xe   :  { %813 = vset.pattern.permute.xlu1 %v832_v34 }
   0xf   :  { %412 = vperm.xlu1 %813, %v863_v6  }
  0x82   :  { %v20_v9 = vpop.permute.xlu0 %19 }
  0x84   :  { %v327_v28 = vpop.permute.xlu1 %326 }
  0x87   :  { %v100_v18 = vpop.permute.xlu0 %99 }
  0x89   :  { %v334_v35 = vpop.permute.xlu1 %333 }
  0x8c   :  { %v714_v57 = vpop.permute.xlu0 %713 }
  0x8e   :  { %v413_v44 = vpop.permute.xlu1 %412 }
  0xda   :  { %v92_v10 = vpop.f32.mrb[0].mxu0 }
  0xdb   :  { %v93_v11 = vadd.f32 %v92_v10, %v20_v9  ;;  %v756_v12 = vpop.f32.mrb[1].mxu0 }
  0xdd   :  { %815 = vtanh.f32 %v93_v11 }
  0xde   :  { %v321_v24 = vpop.f32.mrb[2].mxu0 }
  0xdf   :  { %v771_v25 = vpop.f32.mrb[3].mxu0 }
  0xe7   :  { %v816_v14 = vpop.eup %815 }
  0xe8   :  { %758 = vmatpush3.msra.mxu1 %v816_v14 }
  0xe9   :  { %760 = vmatmul.mubr.msk.f32.vlgmr.msra.gmra.mrb[0].mxu1 %vm102_vm2, %v97_v13  ;;  %762 = vmatprep.subr.mxu1 %v827_v3 }
  0xea   :  { %764 = vmatprep.mubr.msk.f32.mxu1 %vm826_vm0, %v827_v3 }
 0x1bc   :  { %v172_v19 = vpop.f32.mrb[0].mxu1 }
 0x1bd   :  { %v173_v20 = vadd.f32 %v172_v19, %v100_v18  ;;  %v761_v21 = vpop.f32.mrb[1].mxu1 }
 0x1bf   :  { %817 = vtanh.f32 %v173_v20 }
 0x1c9   :  { %v818_v23 = vpop.eup %817 }
 0x1ca   :  { %763 = vmatpush3.msra.mxu1 %v818_v23 }
 0x1cb   :  { %765 = vmatmul.mubr.msk.f32.vlgmr.msra.gmra.mrb[2].mxu1 %vm102_vm2, %v178_v22  ;;  %772 = vmatprep.subr.mxu1 %v827_v3 }
 0x1cc   :  { %774 = vmatprep.mubr.msk.f32.mxu1 %vm826_vm0, %v827_v3 }
 0x29e   :  { %v248_v27 = vpop.f32.mrb[2].mxu1 }
 0x29f   :  { %v322_v29 = vadd.f32 %v321_v24, %v248_v27  ;;  %v766_v30 = vpop.f32.mrb[3].mxu1 }
 0x2a1   :  { %v329_v31 = vadd.f32 %v327_v28, %v322_v29 }
 0x2a3   :  { %819 = vtanh.f32 %v329_v31 }
 0x2ad   :  { %v820_v33 = vpop.eup %819 }
 0x2ae   :  { %773 = vmatpush3.msra.mxu1 %v820_v33 }
 0x2af   :  { %775 = vmatmul.mubr.msk.f32.vlgmr.msra.gmra.mrb[4].mxu1 %vm102_vm2, %v331_v32  ;;  %782 = vmatprep.subr.mxu1 %v827_v3 }
 0x2b0   :  { %783 = vmatpush3.msra.mxu1 %v816_v14  ;;  %784 = vmatprep.mubr.msk.f32.mxu1 %vm826_vm0, %v827_v3 }
 0x2b1   :  { %792 = vmatprep.subr.mxu1 %v827_v3 }
 0x2b3   :  { %785 = vmatmul.mubr.msk.f32.vlgmr.msra.gmra.mrb[6].mxu1 %vm102_vm2, %v490_v41 }
 0x2b4   :  { %793 = vmatpush3.msra.mxu1 %v852_v1  ;;  %794 = vmatprep.mubr.msk.f32.mxu1 %vm826_vm0, %v827_v3 }
 0x2b7   :  { %795 = vmatmul.mubr.msk.f32.vlgmr.msra.gmra.mrb[8].mxu1 %vm102_vm2, %v637_v42 }
 0x382   :  { %v405_v36 = vpop.f32.mrb[4].mxu1 }
 0x383   :  { %v406_v37 = vadd.f32 %v405_v36, %v334_v35  ;;  %v776_v38 = vpop.f32.mrb[5].mxu1 }
 0x385   :  { %821 = vtanh.f32 %v406_v37 }
 0x386   :  { %v560_v50 = vpop.f32.mrb[6].mxu1 }
 0x387   :  { %v786_v51 = vpop.f32.mrb[7].mxu1 }
 0x38a   :  { %v707_v52 = vpop.f32.mrb[8].mxu1 }
 0x38b   :  { %v796_v53 = vpop.f32.mrb[9].mxu1 }
 0x38f   :  { %v822_v40 = vpop.eup %821 }
 0x390   :  { %778 = vmatpush3.msra.mxu0 %v822_v40 }
 0x391   :  { %780 = vmatmul.mubr.msk.f32.vlgmr.msra.gmra.mrb[4].mxu0 %vm102_vm2, %v410_v39  ;;  %787 = vmatprep.subr.mxu0 %v827_v3 }
 0x392   :  { %789 = vmatprep.mubr.msk.f32.mxu0 %vm826_vm0, %v827_v3 }
 0x464   :  { %v484_v45 = vpop.f32.mrb[4].mxu0 }
 0x465   :  { %v485_v46 = vadd.f32 %v484_v45, %v413_v44  ;;  %v781_v47 = vpop.f32.mrb[5].mxu0 }
 0x467   :  { %823 = vtanh.f32 %v485_v46 }
 0x471   :  { %v824_v49 = vpop.eup %823 }
 0x472   :  { %788 = vmatpush3.msra.mxu0 %v824_v49 }
 0x473   :  { %790 = vmatmul.mubr.msk.f32.vlgmr.msra.gmra.mrb[6].mxu0 %vm102_vm2, %v489_v48 }
 0x546   :  { %v633_v54 = vpop.f32.mrb[6].mxu0 }
 0x547   :  { %v634_v55 = vadd.f32 %v633_v54, %v560_v50  ;;  %v791_v56 = vpop.f32.mrb[7].mxu0 }
 0x549   :  { %v711_v58 = vadd.f32 %v707_v52, %v634_v55 }
 0x54b   :  { %v716_v59 = vadd.f32 %v714_v57, %v711_v58 }
 0x54d   :  { %717 = vst [vmem:[%s939_s2] sm:$0xff] %v716_v59 }

</bundles_post_ra>
